<compile_context>
chip_gen: v6e
topology: v6e:2x2x1
jax: 0.10.0
libtpu: 0.0.40
codegen_flags: <defaults>
</compile_context>

<pallas_src>
import functools

import jax
import jax.numpy as jnp
from jax.experimental import pallas as pl
from jax.experimental.pallas import tpu as pltpu

RATIO = 16  # default reduction ratio of the module


def _accumulate_pool(x_ref, sum_sc, max_sc):
    """Update running sum / running max over the HW axis for one block."""

    @pl.when(pl.program_id(1) == 0)
    def _():
        sum_sc[...] = jnp.zeros_like(sum_sc)
        max_sc[...] = jnp.full_like(max_sc, -jnp.inf)

    x = x_ref[...]  # (TB, C, hw_chunk), native dtype (no full-block f32 copy)
    sum_sc[...] += jnp.sum(x, axis=-1, dtype=jnp.float32)          # (TB, C) f32
    max_sc[...] = jnp.maximum(max_sc[...],
                              jnp.max(x, axis=-1).astype(jnp.float32))


def _pool_only_kernel(x_ref, o_ref, sum_sc, max_sc, *, inv_hw):
    """Emit pooled (avg, max) stats only; MLP+sigmoid done outside in XLA."""
    _accumulate_pool(x_ref, sum_sc, max_sc)

    @pl.when(pl.program_id(1) == pl.num_programs(1) - 1)
    def _():
        o_ref[:, 0, :] = (sum_sc[...] * inv_hw).astype(o_ref.dtype)
        o_ref[:, 1, :] = max_sc[...].astype(o_ref.dtype)


def _fused_kernel(x_ref, w1t_ref, w2t_ref, o_ref, sum_sc, max_sc, *, inv_hw):
    """Pooling + fused shared-MLP (avg/max rows stacked) + sigmoid in-kernel."""
    _accumulate_pool(x_ref, sum_sc, max_sc)

    @pl.when(pl.program_id(1) == pl.num_programs(1) - 1)
    def _():
        tb = sum_sc.shape[0]
        avg = sum_sc[...] * inv_hw                         # (TB, C)
        mx = max_sc[...]                                   # (TB, C)
        stacked = jnp.concatenate([avg, mx], axis=0)       # (2*TB, C)
        h = jnp.dot(stacked, w1t_ref[...],
                    preferred_element_type=jnp.float32)    # (2*TB, C//r)
        h = jnp.maximum(h, 0.0)
        out = jnp.dot(h, w2t_ref[...],
                      preferred_element_type=jnp.float32)  # (2*TB, C)
        o_ref[...] = jax.nn.sigmoid(out[:tb] + out[tb:]).astype(o_ref.dtype)


def _pick_block_geometry(B, C, HW, itemsize):
    """Generation-aware (tb, hw_chunk) selection + physical VMEM size."""
    try:
        phys_vmem = int(pltpu.get_tpu_info().vmem_capacity_bytes)
    except Exception:
        phys_vmem = 64 << 20  # conservative (v7x-sized) fallback

    # Per-buffer block budget; the x block is double-buffered by the pipeline,
    # so 2x this plus scratch/weights/output must stay well under phys_vmem.
    block_budget = max(1 << 20, min(8 << 20, phys_vmem // 16))

    bytes_per_img = C * HW * itemsize

    # Keep >= 2 batch programs when possible (megacore sharding + pipelining).
    tb_cap = max(1, B // 2)
    tb = max(1, min(tb_cap, block_budget // max(1, bytes_per_img)))
    while B % tb:
        tb -= 1

    # Fallback: if one image still exceeds the budget, split HW into
    # lane-dense chunks (multiple of 128 that divides HW).
    hw_chunk = HW
    if tb == 1 and bytes_per_img > block_budget:
        target = max(128, block_budget // max(1, C * itemsize))
        cand = (min(target, HW) // 128) * 128
        while cand >= 128:
            if HW % cand == 0:
                hw_chunk = cand
                break
            cand -= 128
        # If no 128-multiple divisor exists, keep hw_chunk = HW.

    return phys_vmem, tb, hw_chunk


def channel_attention_forward(x, w1, w2):
    """x: (B, C, H, W); w1: (C//r, C) [Conv2d(C, C//r, 1)]; w2: (C, C//r).

    Returns the (B, C, 1, 1) channel-attention map, matching the PyTorch forward.
    """
    B, C, H, W = x.shape
    Cr = w1.shape[0]
    HW = H * W
    itemsize = x.dtype.itemsize

    phys_vmem, tb, hw_chunk = _pick_block_geometry(B, C, HW, itemsize)
    n_hw = HW // hw_chunk
    inv_hw = 1.0 / float(HW)

    # Lane-dense layout: flatten spatial dims (free contiguous reshape in XLA).
    x3 = x.reshape(B, C, HW)

    # Pre-transpose the 1x1-conv weights so in-kernel matmuls need no relayout.
    w1t = jnp.asarray(w1, jnp.float32).T  # (C, C//r)
    w2t = jnp.asarray(w2, jnp.float32).T  # (C//r, C)

    # Keep the tiny MLP off the MXU when C is small: pooled stats come out of
    # the kernel and XLA does the (negligible) MLP + sigmoid. Fused path only
    # when the MXU gets a real N dim and the output tile is layout-friendly.
    fuse_mlp = (Cr > 8) and (tb == B or tb % 8 == 0)

    grid = (B // tb, n_hw)
    x_spec = pl.BlockSpec((tb, C, hw_chunk), lambda b, h: (b, 0, h))
    scratch = [pltpu.VMEM((tb, C), jnp.float32),
               pltpu.VMEM((tb, C), jnp.float32)]

    # Explicit VMEM limit: 2x input block (double buffer) + weights + output +
    # scratch + margin, clamped below physical capacity.
    x_block_bytes = tb * C * hw_chunk * itemsize
    small_bytes = 2 * C * Cr * 4 + 2 * tb * C * 4 + 2 * tb * 2 * C * 4
    needed = 2 * x_block_bytes + small_bytes + (2 << 20)
    vmem_limit = int(min(int(phys_vmem * 0.9), max(needed, 32 << 20)))

    compiler_params = pltpu.CompilerParams(
        dimension_semantics=("parallel", "arbitrary"),
        vmem_limit_bytes=vmem_limit)

    cost = pl.CostEstimate(
        flops=3 * B * C * HW + 2 * (2 * B) * C * Cr * 2,
        transcendentals=(B * C) if fuse_mlp else 0,
        bytes_accessed=B * C * HW * itemsize + 2 * C * Cr * 4 + B * 2 * C * 4)

    if fuse_mlp:
        kernel = functools.partial(_fused_kernel, inv_hw=inv_hw)
        out2d = pl.pallas_call(
            kernel,
            out_shape=jax.ShapeDtypeStruct((B, C), x.dtype),
            grid=grid,
            in_specs=[x_spec,
                      pl.BlockSpec((C, Cr), lambda b, h: (0, 0)),
                      pl.BlockSpec((Cr, C), lambda b, h: (0, 0))],
            out_specs=pl.BlockSpec((tb, C), lambda b, h: (b, 0)),
            scratch_shapes=scratch,
            compiler_params=compiler_params,
            cost_estimate=cost,
        )(x3, w1t, w2t)
        return out2d.reshape(B, C, 1, 1)

    # Pooling-only kernel; MLP + sigmoid in plain XLA on the tiny (2B, C) stats.
    kernel = functools.partial(_pool_only_kernel, inv_hw=inv_hw)
    pooled = pl.pallas_call(
        kernel,
        out_shape=jax.ShapeDtypeStruct((B, 2, C), jnp.float32),
        grid=grid,
        in_specs=[x_spec],
        out_specs=pl.BlockSpec((tb, 2, C), lambda b, h: (b, 0, 0)),
        scratch_shapes=scratch,
        compiler_params=compiler_params,
        cost_estimate=cost,
    )(x3)

    stacked = jnp.concatenate([pooled[:, 0, :], pooled[:, 1, :]], axis=0)  # (2B, C)
    h = jnp.maximum(stacked @ w1t, 0.0)
    out = h @ w2t
    ca = jax.nn.sigmoid(out[:B] + out[B:]).astype(x.dtype)
    return ca.reshape(B, C, 1, 1)


def channel_attention_ref(x, w1, w2):
    """Pure-JAX reference matching the PyTorch module's forward."""
    avg = jnp.mean(x, axis=(2, 3), keepdims=True)
    mx = jnp.max(x, axis=(2, 3), keepdims=True)

    def mlp(v):
        h = jnp.einsum('oc,bcij->boij', w1, v)
        h = jnp.maximum(h, 0.0)
        return jnp.einsum('oc,bcij->boij', w2, h)

    return jax.nn.sigmoid(mlp(avg) + mlp(mx))


if __name__ == "__main__":
    key = jax.random.PRNGKey(0)
    kx, k1, k2 = jax.random.split(key, 3)

    # in_planes must be >= ratio for the module's Conv2d(C, C//ratio, 1) to be valid.
    B, C, H, W = 2, 32, 16, 16
    Cr = C // RATIO

    x = jax.random.normal(kx, (B, C, H, W), jnp.float32)
    # Synthetic weights with the shapes the module's __init__ implies
    # (1x1 convs, bias=False -> effectively (out, in) matrices).
    w1 = 0.1 * jax.random.normal(k1, (Cr, C), jnp.float32)  # Conv2d(C, C//r, 1)
    w2 = 0.1 * jax.random.normal(k2, (C, Cr), jnp.float32)  # Conv2d(C//r, C, 1)

    out = jax.block_until_ready(channel_attention_forward(x, w1, w2))
    ref = channel_attention_ref(x, w1, w2)

    assert out.shape == (B, C, 1, 1)
    assert bool(jnp.allclose(out, ref, atol=1e-5, rtol=1e-5)), (
        "max abs err = %f" % float(jnp.max(jnp.abs(out - ref))))
    print("KERNEL_OK")
</pallas_src>

<mosaic_0001>
module attributes {stable_mosaic.version = 11 : i64} {
  func.func @_pool_only_kernel(%arg0: i32, %arg1: i32, %arg2: memref<1x32x256xf32, #tpu.memory_space<vmem>>, %arg3: memref<1x2x32xf32, #tpu.memory_space<vmem>>, %arg4: memref<1x32xf32, #tpu.memory_space<vmem>>, %arg5: memref<1x32xf32, #tpu.memory_space<vmem>>) attributes {dimension_semantics = [#tpu.dimension_semantics<parallel>, #tpu.dimension_semantics<arbitrary>], iteration_bounds = array<i64: 2, 1>, scalar_prefetch = 0 : i64, scratch_operands = 2 : i64, tpu.core_type = #tpu.core_type<tc>, window_params = [{transform_indices = @transform_0, window_bounds = array<i64: 1, 32, 256>}, {transform_indices = @transform_1, window_bounds = array<i64: 1, 2, 32>}]} {
    %c0_i32 = arith.constant 0 : i32
    %0 = arith.cmpi eq, %arg1, %c0_i32 : i32
    %1 = arith.extui %0 : i1 to i32
    %c0_i32_0 = arith.constant 0 : i32
    %2 = arith.cmpi ne, %1, %c0_i32_0 : i32
    scf.if %2 {
      %cst_14 = arith.constant 0.000000e+00 : f32
      %15 = vector.broadcast %cst_14 : f32 to vector<1x32xf32>
      %c0_15 = arith.constant 0 : index
      %c0_16 = arith.constant 0 : index
      %16 = vector.load %arg4[%c0_15, %c0_16] : memref<1x32xf32, #tpu.memory_space<vmem>>, vector<1x32xf32>
      tpu.vector_store %arg4[%c0_15, %c0_16], %15 {strides = array<i32>} : memref<1x32xf32, #tpu.memory_space<vmem>>, vector<1x32xf32>,
      %cst_17 = arith.constant 0xFF800000 : f32
      %17 = vector.broadcast %cst_17 : f32 to vector<1x32xf32>
      %c0_18 = arith.constant 0 : index
      %c0_19 = arith.constant 0 : index
      %18 = vector.load %arg5[%c0_18, %c0_19] : memref<1x32xf32, #tpu.memory_space<vmem>>, vector<1x32xf32>
      tpu.vector_store %arg5[%c0_18, %c0_19], %17 {strides = array<i32>} : memref<1x32xf32, #tpu.memory_space<vmem>>, vector<1x32xf32>,
    } else {
    }
    %c0 = arith.constant 0 : index
    %c0_1 = arith.constant 0 : index
    %c0_2 = arith.constant 0 : index
    %3 = vector.load %arg2[%c0, %c0_1, %c0_2] : memref<1x32x256xf32, #tpu.memory_space<vmem>>, vector<1x32x256xf32>
    %c0_3 = arith.constant 0 : index
    %c0_4 = arith.constant 0 : index
    %4 = vector.load %arg4[%c0_3, %c0_4] : memref<1x32xf32, #tpu.memory_space<vmem>>, vector<1x32xf32>
    %cst = arith.constant dense<0.000000e+00> : vector<1x32xf32>
    %5 = vector.multi_reduction <add>, %3, %cst [2] : vector<1x32x256xf32> to vector<1x32xf32>
    %6 = arith.addf %4, %5 : vector<1x32xf32>
    %c0_5 = arith.constant 0 : index
    %c0_6 = arith.constant 0 : index
    %7 = vector.load %arg4[%c0_5, %c0_6] : memref<1x32xf32, #tpu.memory_space<vmem>>, vector<1x32xf32>
    tpu.vector_store %arg4[%c0_5, %c0_6], %6 {strides = array<i32>} : memref<1x32xf32, #tpu.memory_space<vmem>>, vector<1x32xf32>,
    %c0_7 = arith.constant 0 : index
    %c0_8 = arith.constant 0 : index
    %8 = vector.load %arg5[%c0_7, %c0_8] : memref<1x32xf32, #tpu.memory_space<vmem>>, vector<1x32xf32>
    %cst_9 = arith.constant dense<0xFF800000> : vector<1x32xf32>
    %9 = vector.multi_reduction <maximumf>, %3, %cst_9 [2] : vector<1x32x256xf32> to vector<1x32xf32>
    %10 = arith.maximumf %8, %9 : vector<1x32xf32>
    %c0_10 = arith.constant 0 : index
    %c0_11 = arith.constant 0 : index
    %11 = vector.load %arg5[%c0_10, %c0_11] : memref<1x32xf32, #tpu.memory_space<vmem>>, vector<1x32xf32>
    tpu.vector_store %arg5[%c0_10, %c0_11], %10 {strides = array<i32>} : memref<1x32xf32, #tpu.memory_space<vmem>>, vector<1x32xf32>,
    %c0_i32_12 = arith.constant 0 : i32
    %12 = arith.cmpi eq, %arg1, %c0_i32_12 : i32
    %13 = arith.extui %12 : i1 to i32
    %c0_i32_13 = arith.constant 0 : i32
    %14 = arith.cmpi ne, %13, %c0_i32_13 : i32
    scf.if %14 {
      %c0_14 = arith.constant 0 : index
      %c0_15 = arith.constant 0 : index
      %15 = vector.load %arg4[%c0_14, %c0_15] : memref<1x32xf32, #tpu.memory_space<vmem>>, vector<1x32xf32>
      %cst_16 = arith.constant 3.906250e-03 : f32
      %16 = vector.broadcast %cst_16 : f32 to vector<1x32xf32>
      %17 = arith.mulf %15, %16 : vector<1x32xf32>
      %c0_17 = arith.constant 0 : index
      %c0_18 = arith.constant 0 : index
      %c0_19 = arith.constant 0 : index
      %18 = vector.load %arg3[%c0_17, %c0_18, %c0_19] : memref<1x2x32xf32, #tpu.memory_space<vmem>>, vector<1x1x32xf32>
      %19 = vector.shape_cast %18 : vector<1x1x32xf32> to vector<1x32xf32>
      %20 = vector.shape_cast %17 : vector<1x32xf32> to vector<1x1x32xf32>
      tpu.vector_store %arg3[%c0_17, %c0_18, %c0_19], %20 {strides = array<i32>} : memref<1x2x32xf32, #tpu.memory_space<vmem>>, vector<1x1x32xf32>,
      %c0_20 = arith.constant 0 : index
      %c0_21 = arith.constant 0 : index
      %21 = vector.load %arg5[%c0_20, %c0_21] : memref<1x32xf32, #tpu.memory_space<vmem>>, vector<1x32xf32>
      %c0_22 = arith.constant 0 : index
      %c1 = arith.constant 1 : index
      %c0_23 = arith.constant 0 : index
      %22 = vector.load %arg3[%c0_22, %c1, %c0_23] : memref<1x2x32xf32, #tpu.memory_space<vmem>>, vector<1x1x32xf32>
      %23 = vector.shape_cast %22 : vector<1x1x32xf32> to vector<1x32xf32>
      %24 = vector.shape_cast %21 : vector<1x32xf32> to vector<1x1x32xf32>
      tpu.vector_store %arg3[%c0_22, %c1, %c0_23], %24 {strides = array<i32>} : memref<1x2x32xf32, #tpu.memory_space<vmem>>, vector<1x1x32xf32>,
    } else {
    }
    return
  }
  func.func @transform_0(%arg0: i32, %arg1: i32) -> (i32, i32, i32) {
    %c0_i32 = arith.constant 0 : i32
    %c0_i32_0 = arith.constant 0 : i32
    return %arg0, %c0_i32, %arg1 : i32, i32, i32
  }
  func.func @transform_1(%arg0: i32, %arg1: i32) -> (i32, i32, i32) {
    %c0_i32 = arith.constant 0 : i32
    %c0_i32_0 = arith.constant 0 : i32
    %c0_i32_1 = arith.constant 0 : i32
    return %arg0, %c0_i32, %c0_i32_0 : i32, i32, i32
  }
}

</mosaic_0001>

<bundles_post_ra>
// kernel: tpu_custom_call.1
= control target key start
LH: loop header
LB: loop body
LE: loop exit
PB: predicated region body
PF: predicated region fallthrough
CT: control target
= control target key end

     0   :  { %6 = vsyncpa [#allocation5], 0  ;;  %s1572_s0 = inlined_call_operand.hbm [shape: f32[2,32,256], index: 0, kind: input, shape index: {}]   ;;  %s1573_s1 = inlined_call_operand.hbm [shape: f32[2,2,32], index: 1, kind: output, shape index: {}]  }
   0x1   :  { %8 = vsyncpa [#allocation5 + $0x1], 0 }
   0x2   :  { %9 = vsyncpa [#allocation6], 0 }
   0x3   :  { %11 = vsyncpa [#allocation6 + $0x1], 0  ;;  %s1270_s6 = smov 0   ;;  %s1272_s7 = smov 0  }
   0x4   :  { %s1274_s8 = smov 0   ;;  %s1276_s9 = smov 0  }
   0x5   :  { %s1278_s10 = smov 0   ;;  %s1280_s11 = smov 0  }
   0x6 LB: > { %s1057_s12 = sadd.s32 4294967295, %s1250_s11   ;;  %s1058_s13 = sadd.s32 4294967294, %s1250_s11   ;;  %s1250_s11 = sphi %s1280_s11, %s17_s11   ;;  %s1246_s10 = sphi %s1278_s10, %s1584_s10   ;;  %s1242_s9 = sphi %s1276_s9, %s1583_s9   ;;  %s1238_s8 = sphi %s1274_s8, %s1582_s8   ;;  %s1234_s7 = sphi %s1272_s7, %s1581_s7   ;;  %s1230_s6 = sphi %s1270_s6, %s1580_s6  }
   0x7   : > { %s29_s14 = sadd.s32 1, %s1246_s10  ;;  %s38_s15 = sadd.s32 1, %s1238_s8 }
   0x8   : > { %p31_p0 = scmp.ge.s32.totalorder %s29_s14, 2  ;;  %p45_p1 = scmp.ne.s32.totalorder %s1238_s8, %s1234_s7 }
   0x9   : > { %p46_p2 = scmp.eq.s32.totalorder %s1250_s11, 0  ;;  %p51_p3 = scmp.ne.s32.totalorder %s1234_s7, %s1230_s6 }
   0xa   : > { %s1586_s14 = smov (%p31_p0, %s29_s14), 0  ;;  %p52_p5 = scmp.eq.s32.totalorder %s1057_s12, 0 }
   0xb   : > { %p1311_p4 = por %p46_p2, %p45_p1  ;;  %s33_s17 = ssub.s32 %s1246_s10, %s1586_s14 }
   0xc   : > { %p75_p6 = scmp.eq.s32.totalorder %s1057_s12, 1  ;;  %p36_p7 = scmp.eq.s32.totalorder %s33_s17, 0 }
   0xd   : > { %p1317_p8 = por %p52_p5, %p51_p3  ;;  %p81_p10 = scmp.eq.s32.totalorder %s1058_s13, 1 }
   0xe   : > { %p1321_p9 = por %p75_p6, %p45_p1  ;;  %p1084_p13 = scmp.lt.s32.totalorder %s1250_s11, 2 }
   0xf   : > { %s1326_s20 = scalar_select %p36_p7, %s1238_s8, %s38_s15  }
  0x10   : > { %p1328_p11 = por %p81_p10, %p51_p3  ;;  %s101_s22 = sand.u32 1, %s1238_s8  }
  0x11   : > { %s1061_s23 = sshll.u32 %s101_s22, 6  ;;  %s1071_s24 = sshll.u32 %s1246_s10, 10 }
  0x12   : > { %s113_s27 = scalar_lea.hbm %s1572_s0, %s1071_s24  ;;  %s105_s28 = scalar_lea.vmem [#allocation4], %s1061_s23 }
  0x13   : > { %s114_s29 = sshll.u32 %s105_s28, 4  ;;  %p1341_p0 = pnand %p1084_p13, %p1311_p4  ;;  %s115_s29 = int_to_ptr.vmem [resolvable:$true] %s114_s29 }
  0x14   : > { %p1064_p1 = scmp.ge.s32.totalorder %s1250_s11, 1  ;;  %s102_s2 = scalar_lea.sflag [#allocation5], %s101_s22 }
  0x15   : > { %p1144_p2 = pneg %p1341_p0  ;;  %s1155_s3 = scalar_lea.vmem %s115_s29, 1024 }
  0x16   : > { %p1156_p3 = scmp.ne.s32.totalorder %s115_s29, %s1155_s3  ;;  %s1252_s4 = smov [#allocation4]  }
  0x17   : > { %s1160_s5 = sshll.u32 %s1252_s4, 4  ;;  %s1161_s5 = int_to_ptr.vmem [resolvable:$false] %s1160_s5 }
  0x18   : > { %p1158_p5 = pnand %p1156_p3, %p1144_p2  ;;  %s1162_s12 = scalar_lea.vmem %s1161_s5, 2048 }
  0x19   : > { %p1163_p7 = scmp.lt.s32.totalorder %s115_s29, %s1161_s5  ;;  %p1164_p10 = scmp.lt.s32.totalorder %s1162_s12, %s1155_s3 }
  0x1a   : > { %p1159_p6 = pneg %p1158_p5 }
  0x1b   : > { %p1165_p12 = por %p1164_p10, %p1163_p7 }
  0x1d   : > { %p1166_p4 = pnand %p1165_p12, %p1159_p6 }
  0x1f   : > { %1169 = shalt.err (!%p1166_p4)
}
  0x20   : > { %s1253_s13 = smov 256   ;;  %s1254_s15 = smov 16  }
  0x21   : > { %1079 = dma.hbm_to_vmem [thread:$0]  (!%p1341_p0), %s113_s27, 1024, %s115_s29, %s102_s2, %s1253_s13, %s1253_s13, %s1254_s15  }
  0x22   : > { %p122_p13 = scmp.lt.s32.totalorder %s1250_s11, 3 }
  0x24   : > { %p123_p2 = pnand %p1064_p1, %p122_p13 }
  0x25   : > { %s1354_s16 = sand.u32 (!%p123_p2), 1, %s1234_s7  }
  0x26   : > { %126 = sbr.rel (%p123_p2) target bundleno = 388 (0x184), region = 24  ;;  %s1065_s17 = sshll.u32 (!%p123_p2), %s1354_s16, 6 }
  0x27   : > { %s129_s22 = scalar_lea.sflag (!%p123_p2), [#allocation5], %s1354_s16  ;;  %s132_s23 = scalar_lea.vmem (!%p123_p2), [#allocation4], %s1065_s17 }
  0x2b   : > { %1221 = dma.done.wait (%p1317_p8), %s129_s22, 1024  }
  0x2c   : > { %1223 = vsyncadd (%p1317_p8), %s129_s22, 4294966272  ;;  %v159_v0 = vld [vmem:[%s132_s23] sm:$0xff]  ;;  %v160_v1 = vld [vmem:[%s132_s23 + $0x8] sm:$0xff]  ;;  %v1255_v16 = vmov 0   ;;  %v184_v17 = vlaneseq  ;;  %v1256_v18 = vmov 1966171168  }
  0x2d   : > { %v161_v2 = vld [vmem:[%s132_s23 + $0x10] sm:$0xff]  ;;  %v168_v3 = vadd.f32 %v160_v1, %v159_v0  ;;  %v162_v4 = vld [vmem:[%s132_s23 + $0x18] sm:$0xff]  ;;  %v163_v5 = vld [vmem:[%s132_s23 + $0x20] sm:$0xff]  ;;  %v566_v12 = vmax.f32 %v159_v0, %v160_v1  ;;  %1140 = vset.pattern.permute.xlu0 %v1255_v16  ;;  %1141 = vset.pattern.permute.xlu1 %v1255_v16  ;;  %v317_v19 = vunpack.c.l.s4 %v1256_v18  ;;  %vm156_vm0 = vcmask 253952   ;;  %s1066_s18 = sshll.u32 %s1354_s16, 1  ;;  %s1068_s25 = sshll.u32 %s1242_s9, 5 }
  0x2e   : > { %v164_v6 = vld [vmem:[%s132_s23 + $0x28] sm:$0xff]  ;;  %v165_v8 = vld [vmem:[%s132_s23 + $0x30] sm:$0xff]  ;;  %v166_v9 = vld [vmem:[%s132_s23 + $0x38] sm:$0xff]  ;;  %v171_v10 = vadd.f32 %v162_v4, %v161_v2  ;;  %v569_v13 = vmax.f32 %v161_v2, %v162_v4  ;;  %v1363_v20 = vshrl.u32 %v184_v17, 7  ;;  %vm531_vm1 = vcmask 130112   ;;  %s150_s24 = scalar_lea.vmem [#allocation7], %s1066_s18  ;;  %s1529_s29 = scalar_lea.hbm %s1573_s1, %s1068_s25 }
  0x2f   : > { %v174_v7 = vadd.f32 %v164_v6, %v163_v5  ;;  %169 = vadd.xlane.f32.xlu0 %v168_v3  ;;  %v177_v11 = vadd.f32 %v166_v9, %v165_v8  ;;  %v572_v14 = vmax.f32 %v163_v5, %v164_v6  ;;  %v575_v15 = vmax.f32 %v165_v8, %v166_v9  ;;  %s976_s26 = sshll.u32 %s150_s24, 4  ;;  %s963_s30 = scalar_lea.sflag [#allocation6], %s1354_s16  ;;  %s977_s26 = int_to_ptr.vmem [resolvable:$true] %s976_s26 }
  0x30   : > { %v318_v21 = vunpack.c.0.s8 %v317_v19  ;;  %v1366_v22 = vsub.s32 0, %v1363_v20  ;;  %v1369_v23 = vsub.s32 1, %v1363_v20  ;;  %v1372_v24 = vsub.s32 2, %v1363_v20  ;;  %s1170_s2 = scalar_lea.vmem %s977_s26, 32  ;;  %s1259_s3 = smov [#allocation7]  }
  0x31   : > { %175 = vadd.xlane.f32.xlu1 %v174_v7  ;;  %v1375_v25 = vsub.s32 3, %v1363_v20  ;;  %v1378_v26 = vsub.s32 4, %v1363_v20  ;;  %v1381_v27 = vsub.s32 5, %v1363_v20  ;;  %v1384_v28 = vsub.s32 6, %v1363_v20  ;;  %p1171_p8 = scmp.ne.s32.totalorder %s977_s26, %s1170_s2  ;;  %s1174_s4 = sshll.u32 %s1259_s3, 4  ;;  %s1175_s4 = int_to_ptr.vmem [resolvable:$false] %s1174_s4 }
  0x32   : > { %v1387_v29 = vsub.s32 7, %v1363_v20  ;;  %v1390_v31 = vsub.s32 %v318_v21, %v1363_v20  ;;  %vm538_vm2 = vcmask 195712   ;;  %vm545_vm3 = vcmask 261312   ;;  %s1176_s9 = scalar_lea.vmem %s1175_s4, 64  ;;  %p1177_p1 = scmp.lt.s32.totalorder %s977_s26, %s1175_s4 }
  0x33   : > { %172 = vadd.xlane.f32.xlu0 %v171_v10  ;;  %p1172_p12 = pnand %p1171_p8, %p1321_p9  ;;  %p1178_p3 = scmp.lt.s32.totalorder %s1176_s9, %s1170_s2 }
  0x35   : > { %178 = vadd.xlane.f32.xlu1 %v177_v11  ;;  %p1173_p0 = pneg %p1172_p12  ;;  %p1179_p5 = por %p1178_p3, %p1177_p1 }
  0x37   : > { %567 = vmax.xlane.f32.xlu0 %v566_v12  ;;  %p1180_p6 = pnand %p1179_p5, %p1173_p0 }
  0x39   : > { %570 = vmax.xlane.f32.xlu1 %v569_v13 }
  0x3b   : > { %573 = vmax.xlane.f32.xlu0 %v572_v14 }
  0x3d   : > { %576 = vmax.xlane.f32.xlu1 %v575_v15 }
  0xb8   : > { %v170_v30 = vpop.xlane.xlu0 %169 }
  0xb9   : > { %v187_v33 = vrot.slane %v170_v30, %v1366_v22  ;;  %v191_v34 = vrot.slane %v170_v30, %v1369_v23  ;;  %v195_v35 = vrot.slane %v170_v30, %v1372_v24  ;;  %v199_v36 = vrot.slane %v170_v30, %v1375_v25 }
  0xba   : > { %v176_v32 = vpop.xlane.xlu1 %175  ;;  %v203_v37 = vrot.slane %v170_v30, %v1378_v26  ;;  %v207_v38 = vrot.slane %v170_v30, %v1381_v27  ;;  %v211_v39 = vrot.slane %v170_v30, %v1384_v28  ;;  %v215_v40 = vrot.slane %v170_v30, %v1387_v29 }
  0xbb   : > { %v312_v41 = vcombine.low %v187_v33, %v191_v34  ;;  %v313_v42 = vcombine.low %v195_v35, %v199_v36  ;;  %v251_v43 = vrot.slane %v176_v32, %v1366_v22  ;;  %v255_v44 = vrot.slane %v176_v32, %v1369_v23 }
  0xbc   : > { %v173_v45 = vpop.xlane.xlu0 %172  ;;  %v314_v46 = vcombine.low %v203_v37, %v207_v38  ;;  %v315_v47 = vcombine.low %v211_v39, %v215_v40  ;;  %v259_v48 = vrot.slane %v176_v32, %v1372_v24  ;;  %v263_v49 = vrot.slane %v176_v32, %v1375_v25 }
  0xbd   : > { %v322_v50 = vrot.slane %v312_v41, %v1390_v31  ;;  %v329_v51 = vrot.slane %v313_v42, %v1390_v31  ;;  %v219_v52 = vrot.slane %v173_v45, %v1366_v22  ;;  %v223_v53 = vrot.slane %v173_v45, %v1369_v23 }
  0xbe   : > { %v336_v54 = vrot.slane %v314_v46, %v1390_v31  ;;  %v343_v55 = vrot.slane %v315_v47, %v1390_v31  ;;  %v227_v56 = vrot.slane %v173_v45, %v1372_v24  ;;  %v231_v57 = vrot.slane %v173_v45, %v1375_v25  ;;  %v179_v6 = vpop.xlane.xlu1 %178 }
  0xbf   : > { %v344_v58 = vcombine.low %v322_v50, %v329_v51  ;;  %v235_v59 = vrot.slane %v173_v45, %v1378_v26  ;;  %v239_v60 = vrot.slane %v173_v45, %v1381_v27  ;;  %v243_v61 = vrot.slane %v173_v45, %v1384_v28 }
  0xc0   : > { %v345_v62 = vcombine.low %v336_v54, %v343_v55  ;;  %v247_v63 = vrot.slane %v173_v45, %v1387_v29  ;;  %v361_v0 = vcombine.low %v219_v52, %v223_v53  ;;  %v362_v1 = vcombine.low %v227_v56, %v231_v57  ;;  %v568_v42 = vpop.xlane.xlu0 %567 }
  0xc1   : > { %v352_v2 = vrot.slane %v344_v58, %v1390_v31  ;;  %v363_v3 = vcombine.low %v235_v59, %v239_v60  ;;  %v267_v4 = vrot.slane %v176_v32, %v1378_v26  ;;  %v271_v5 = vrot.slane %v176_v32, %v1381_v27 }
  0xc2   : > { %v359_v7 = vrot.slane %v345_v62, %v1390_v31  ;;  %v364_v8 = vcombine.low %v243_v61, %v247_v63  ;;  %v371_v9 = vrot.slane %v361_v0, %v1390_v31  ;;  %v378_v10 = vrot.slane %v362_v1, %v1390_v31  ;;  %v571_v59 = vpop.xlane.xlu1 %570 }
  0xc3   : > { %v385_v11 = vrot.slane %v363_v3, %v1390_v31  ;;  %v275_v12 = vrot.slane %v176_v32, %v1384_v28  ;;  %v279_v13 = vrot.slane %v176_v32, %v1387_v29  ;;  %v410_v14 = vcombine.low %v251_v43, %v255_v44 }
  0xc4   : > { %v360_v15 = vcombine.low %v352_v2, %v359_v7  ;;  %v392_v16 = vrot.slane %v364_v8, %v1390_v31  ;;  %v393_v18 = vcombine.low %v371_v9, %v378_v10  ;;  %v411_v19 = vcombine.low %v259_v48, %v263_v49 }
  0xc5   : > { %v412_v21 = vcombine.low %v267_v4, %v271_v5  ;;  %v413_v30 = vcombine.low %v275_v12, %v279_v13  ;;  %v420_v33 = vrot.slane %v410_v14, %v1390_v31  ;;  %v283_v34 = vrot.slane %v179_v6, %v1366_v22 }
  0xc6   : > { %509 = vperm.xlu0 %1140, %v360_v15   ;;  %v394_v35 = vcombine.low %v385_v11, %v392_v16  ;;  %v401_v36 = vrot.slane %v393_v18, %v1390_v31  ;;  %v427_v37 = vrot.slane %v411_v19, %v1390_v31  ;;  %v287_v32 = vrot.slane %v179_v6, %v1369_v23 }
  0xc7   : > { %v434_v38 = vrot.slane %v412_v21, %v1390_v31  ;;  %v441_v39 = vrot.slane %v413_v30, %v1390_v31  ;;  %v291_v40 = vrot.slane %v179_v6, %v1372_v24  ;;  %v295_v41 = vrot.slane %v179_v6, %v1375_v25  ;;  %v574_v30 = vpop.xlane.xlu0 %573 }
  0xc8   : > { %v408_v43 = vrot.slane %v394_v35, %v1390_v31  ;;  %v442_v44 = vcombine.low %v420_v33, %v427_v37  ;;  %v299_v45 = vrot.slane %v179_v6, %v1378_v26  ;;  %v303_v46 = vrot.slane %v179_v6, %v1381_v27 }
  0xc9   : > { %v443_v47 = vcombine.low %v434_v38, %v441_v39  ;;  %v307_v48 = vrot.slane %v179_v6, %v1384_v28  ;;  %v311_v49 = vrot.slane %v179_v6, %v1387_v29  ;;  %v459_v50 = vcombine.low %v283_v34, %v287_v32 }
  0xca   : > { %v409_v51 = vcombine.low %v401_v36, %v408_v43  ;;  %v450_v52 = vrot.slane %v442_v44, %v1390_v31  ;;  %v460_v53 = vcombine.low %v291_v40, %v295_v41  ;;  %v461_v54 = vcombine.low %v299_v45, %v303_v46 }
  0xcb   : > { %v457_v55 = vrot.slane %v443_v47, %v1390_v31  ;;  %v462_v56 = vcombine.low %v307_v48, %v311_v49  ;;  %v469_v57 = vrot.slane %v459_v50, %v1390_v31  ;;  %v585_v58 = vrot.slane %v568_v42, %v1366_v22 }
  0xcc   : > { %512 = vperm.xlu1 %1141, %v409_v51   ;;  %v476_v60 = vrot.slane %v460_v53, %v1390_v31  ;;  %v483_v61 = vrot.slane %v461_v54, %v1390_v31  ;;  %v589_v62 = vrot.slane %v568_v42, %v1369_v23  ;;  %v593_v63 = vrot.slane %v568_v42, %v1372_v24 }
  0xcd   : > { %v458_v0 = vcombine.low %v450_v52, %v457_v55  ;;  %v490_v1 = vrot.slane %v462_v56, %v1390_v31  ;;  %v597_v2 = vrot.slane %v568_v42, %v1375_v25  ;;  %v601_v3 = vrot.slane %v568_v42, %v1378_v26  ;;  %v577_v52 = vpop.xlane.xlu1 %576 }
  0xce   : > { %v491_v4 = vcombine.low %v469_v57, %v476_v60  ;;  %v605_v5 = vrot.slane %v568_v42, %v1381_v27  ;;  %v609_v6 = vrot.slane %v568_v42, %v1384_v28  ;;  %v613_v7 = vrot.slane %v568_v42, %v1387_v29 }
  0xcf   : > { %v492_v8 = vcombine.low %v483_v61, %v490_v1  ;;  %v710_v9 = vcombine.low %v585_v58, %v589_v62  ;;  %v711_v10 = vcombine.low %v593_v63, %v597_v2  ;;  %v617_v11 = vrot.slane %v571_v59, %v1366_v22 }
  0xd0   : > { %515 = vperm.xlu1 %1141, %v458_v0   ;;  %v499_v12 = vrot.slane %v491_v4, %v1390_v31  ;;  %v712_v13 = vcombine.low %v601_v3, %v605_v5  ;;  %v713_v14 = vcombine.low %v609_v6, %v613_v7  ;;  %v621_v15 = vrot.slane %v571_v59, %v1369_v23 }
  0xd1   : > { %v506_v16 = vrot.slane %v492_v8, %v1390_v31  ;;  %v720_v18 = vrot.slane %v710_v9, %v1390_v31  ;;  %v727_v19 = vrot.slane %v711_v10, %v1390_v31  ;;  %v625_v21 = vrot.slane %v571_v59, %v1372_v24 }
  0xd2   : > { %v734_v33 = vrot.slane %v712_v13, %v1390_v31  ;;  %v741_v34 = vrot.slane %v713_v14, %v1390_v31  ;;  %v629_v35 = vrot.slane %v571_v59, %v1375_v25  ;;  %v633_v36 = vrot.slane %v571_v59, %v1378_v26 }
  0xd3   : > { %v507_v37 = vcombine.low %v499_v12, %v506_v16  ;;  %v742_v32 = vcombine.low %v720_v18, %v727_v19  ;;  %v637_v38 = vrot.slane %v571_v59, %v1381_v27  ;;  %v641_v39 = vrot.slane %v571_v59, %v1384_v28 }
  0xd4   : > { %v743_v40 = vcombine.low %v734_v33, %v741_v34  ;;  %v645_v41 = vrot.slane %v571_v59, %v1387_v29  ;;  %v759_v42 = vcombine.low %v617_v11, %v621_v15  ;;  %v760_v43 = vcombine.low %v625_v21, %v629_v35 }
  0xd5   : > { %518 = vperm.xlu1 %1141, %v507_v37   ;;  %v750_v44 = vrot.slane %v742_v32, %v1390_v31  ;;  %v761_v45 = vcombine.low %v633_v36, %v637_v38  ;;  %v649_v46 = vrot.slane %v574_v30, %v1366_v22  ;;  %v653_v47 = vrot.slane %v574_v30, %v1369_v23 }
  0xd6   : > { %v757_v48 = vrot.slane %v743_v40, %v1390_v31  ;;  %v762_v49 = vcombine.low %v641_v39, %v645_v41  ;;  %v769_v50 = vrot.slane %v759_v42, %v1390_v31  ;;  %v776_v51 = vrot.slane %v760_v43, %v1390_v31 }
  0xd7   : > { %v783_v53 = vrot.slane %v761_v45, %v1390_v31  ;;  %v657_v54 = vrot.slane %v574_v30, %v1372_v24  ;;  %v661_v55 = vrot.slane %v574_v30, %v1375_v25  ;;  %v665_v56 = vrot.slane %v574_v30, %v1378_v26 }
  0xd8   : > { %v758_v57 = vcombine.low %v750_v44, %v757_v48  ;;  %v790_v58 = vrot.slane %v762_v49, %v1390_v31  ;;  %v791_v59 = vcombine.low %v769_v50, %v776_v51  ;;  %v669_v60 = vrot.slane %v574_v30, %v1381_v27 }
  0xd9   : > { %v673_v61 = vrot.slane %v574_v30, %v1384_v28  ;;  %v677_v62 = vrot.slane %v574_v30, %v1387_v29  ;;  %v808_v63 = vcombine.low %v649_v46, %v653_v47  ;;  %v809_v0 = vcombine.low %v657_v54, %v661_v55 }
  0xda   : > { %907 = vperm.xlu1 %1141, %v758_v57   ;;  %v792_v1 = vcombine.low %v783_v53, %v790_v58  ;;  %v799_v2 = vrot.slane %v791_v59, %v1390_v31  ;;  %v810_v3 = vcombine.low %v665_v56, %v669_v60  ;;  %v681_v4 = vrot.slane %v577_v52, %v1366_v22 }
  0xdb   : > { %v811_v5 = vcombine.low %v673_v61, %v677_v62  ;;  %v818_v6 = vrot.slane %v808_v63, %v1390_v31  ;;  %v825_v7 = vrot.slane %v809_v0, %v1390_v31  ;;  %v685_v8 = vrot.slane %v577_v52, %v1369_v23 }
  0xdc   : > { %v806_v9 = vrot.slane %v792_v1, %v1390_v31  ;;  %v832_v10 = vrot.slane %v810_v3, %v1390_v31  ;;  %v689_v11 = vrot.slane %v577_v52, %v1372_v24  ;;  %v693_v12 = vrot.slane %v577_v52, %v1375_v25 }
  0xdd   : > { %v839_v13 = vrot.slane %v811_v5, %v1390_v31  ;;  %v840_v14 = vcombine.low %v818_v6, %v825_v7  ;;  %v697_v22 = vrot.slane %v577_v52, %v1378_v26  ;;  %v701_v15 = vrot.slane %v577_v52, %v1381_v27 }
  0xde   : > { %v807_v16 = vcombine.low %v799_v2, %v806_v9  ;;  %v705_v18 = vrot.slane %v577_v52, %v1384_v28  ;;  %v709_v23 = vrot.slane %v577_v52, %v1387_v29  ;;  %v857_v19 = vcombine.low %v681_v4, %v685_v8 }
  0xdf   : > { %v841_v21 = vcombine.low %v832_v10, %v839_v13  ;;  %v848_v30 = vrot.slane %v840_v14, %v1390_v31  ;;  %v858_v33 = vcombine.low %v689_v11, %v693_v12  ;;  %v859_v24 = vcombine.low %v697_v22, %v701_v15 }
  0xe0   : > { %910 = vperm.xlu1 %1141, %v807_v16   ;;  %v860_v25 = vcombine.low %v705_v18, %v709_v23  ;;  %v867_v34 = vrot.slane %v857_v19, %v1390_v31  ;;  %v1257_v32 = vmov 0.0   ;;  %v1258_v39 = vmov -inf  }
  0xe1   : > { %v855_v35 = vrot.slane %v841_v21, %v1390_v31  ;;  %v874_v26 = vrot.slane %v858_v33, %v1390_v31  ;;  %v881_v27 = vrot.slane %v859_v24, %v1390_v31  ;;  %157 = vst.msk [vmem:[#allocation2] sm:$0x1] %vm156_vm0, %v1257_v32  ;;  %158 = vst.msk [vmem:[#allocation3] sm:$0x1] %vm156_vm0, %v1258_v39  ;;  %v521_v42 = vand.u32 127, %v184_v17 }
  0xe2   : > { %v888_v28 = vrot.slane %v860_v25, %v1390_v31 }
  0xe3   : > { %v856_v29 = vcombine.low %v848_v30, %v855_v35  ;;  %v889_v36 = vcombine.low %v867_v34, %v874_v26  ;;  %v526_v43 = vadd.s32 4294967288, %v521_v42  ;;  %v533_v44 = vadd.s32 4294967280, %v521_v42 }
  0xe4   : > { %v890_v37 = vcombine.low %v881_v27, %v888_v28  ;;  %v540_v47 = vadd.s32 4294967272, %v521_v42  ;;  %v524_v49 = vsub.s32 %v521_v42, %v1363_v20 }
  0xe5   : > { %913 = vperm.xlu1 %1141, %v856_v29   ;;  %v897_v38 = vrot.slane %v889_v36, %v1390_v31  ;;  %v529_v46 = vsub.s32 %v526_v43, %v1363_v20  ;;  %v536_v48 = vsub.s32 %v533_v44, %v1363_v20 }
  0xe6   : > { %v904_v40 = vrot.slane %v890_v37, %v1390_v31  ;;  %v543_v53 = vsub.s32 %v540_v47, %v1363_v20 }
  0xe8   : > { %v905_v41 = vcombine.low %v897_v38, %v904_v40  ;;  %v167_v61 = vld [vmem:[#allocation2] sm:$0x1]  ;;  %v565_v13 = vld [vmem:[#allocation3] sm:$0x1] }
  0xea   : > { %916 = vperm.xlu1 %1141, %v905_v41  }
 0x141   : > { %v510_v51 = vpop.permute.xlu0 %509 }
 0x142   : > { %v525_v55 = vrot.slane %v510_v51, %v524_v49 }
 0x147   : > { %v513_v45 = vpop.permute.xlu1 %512 }
 0x148   : > { %v530_v52 = vrot.slane %v513_v45, %v529_v46 }
 0x14a   : > { %v532_v56 = vsel %vm531_vm1, %v530_v52, %v525_v55 }
 0x14b   : > { %v516_v50 = vpop.permute.xlu1 %515 }
 0x14c   : > { %v537_v54 = vrot.slane %v516_v50, %v536_v48 }
 0x14e   : > { %v539_v58 = vsel %vm538_vm2, %v537_v54, %v532_v56 }
 0x150   : > { %v519_v17 = vpop.permute.xlu1 %518 }
 0x151   : > { %v544_v57 = vrot.slane %v519_v17, %v543_v53 }
 0x153   : > { %v546_v59 = vsel %vm545_vm3, %v544_v57, %v539_v58 }
 0x154   : > { %v553_v60 = vrot.slane %v546_v59, %v1390_v31 }
 0x155   : > { %v908_v62 = vpop.permute.xlu1 %907 }
 0x156   : > { %v560_v20 = vrot.slane %v553_v60, %v1390_v31  ;;  %v921_v6 = vrot.slane %v908_v62, %v524_v49 }
 0x158   : > { %v562_v63 = vadd.f32 %v560_v20, %v167_v61 }
 0x15a   : > { %564 = vst.msk [vmem:[#allocation2] sm:$0x1] %vm156_vm0, %v562_v63 }
 0x15b   : > { %v911_v0 = vpop.permute.xlu1 %910 }
 0x15c   : > { %v925_v3 = vrot.slane %v911_v0, %v529_v46 }
 0x15e   : > { %v926_v8 = vsel %vm531_vm1, %v925_v3, %v921_v6 }
 0x160   : > { %v914_v1 = vpop.permute.xlu1 %913 }
 0x161   : > { %v957_v2 = vld [vmem:[#allocation2] sm:$0x1]  ;;  %v930_v5 = vrot.slane %v914_v1, %v536_v48 }
 0x162   : > { %v958_v4 = vmul.f32 0.00390625, %v957_v2 }
 0x163   : > { %v931_v10 = vsel %vm538_vm2, %v930_v5, %v926_v8 }
 0x164   : > { %959 = vst.msk [vmem:[%s150_s24] sm:$0x1] %vm156_vm0, %v958_v4 }
 0x165   : > { %v917_v7 = vpop.permute.xlu1 %916 }
 0x166   : > { %v935_v9 = vrot.slane %v917_v7, %v543_v53 }
 0x168   : > { %v936_v11 = vsel %vm545_vm3, %v935_v9, %v931_v10 }
 0x169   : > { %v943_v12 = vrot.slane %v936_v11, %v1390_v31 }
 0x16b   : > { %v950_v14 = vrot.slane %v943_v12, %v1390_v31 }
 0x16d   : > { %v952_v22 = vmax.f32 %v565_v13, %v950_v14 }
 0x16f   : > { %953 = vst.msk [vmem:[#allocation3] sm:$0x1] %vm156_vm0, %v952_v22 }
 0x176   : > { %v960_v15 = vld [vmem:[#allocation3] sm:$0x1] }
 0x177   : > { %961 = vst.msk [vmem:[%s150_s24 + $0x1] sm:$0x1] %vm156_vm0, %v960_v15 }
 0x178   : > { %1183 = shalt.err (!%p1180_p6)
}
 0x179   : > { %s1184_s5 = scalar_lea.hbm %s1529_s29, 32  ;;  %s1188_s15 = scalar_lea.hbm %s1573_s1, 64 }
 0x17a   : > { %p1185_p7 = scmp.ne.s32.totalorder %s1529_s29, %s1184_s5  ;;  %p1189_p13 = scmp.lt.s32.totalorder %s1529_s29, %s1573_s1 }
 0x17b   : > { %p1190_p2 = scmp.lt.s32.totalorder %s1188_s15, %s1184_s5 }
 0x17c   : > { %p1186_p10 = pnand %p1185_p7, %p1321_p9 }
 0x17d   : > { %p1191_p8 = por %p1190_p2, %p1189_p13 }
 0x17e   : > { %p1187_p4 = pneg %p1186_p10 }
 0x180   : > { %p1192_p12 = pnand %p1191_p8, %p1187_p4 }
 0x182   : > { %1195 = shalt.err (!%p1192_p12)
}
 0x183   : > { %1074 = dma.vmem_to_hbm [thread:$0]  (%p1321_p9), %s977_s26, 32, %s1529_s29, %s963_s30  }
 0x184 PF: > { %s988_s22 = sand.u32 1, %s1230_s6   ;;  %p1579_p0 = scmp.ge.s32.totalorder %s1250_s11, 2 }
 0x185   : > { %s989_s23 = scalar_lea.sflag [#allocation6], %s988_s22 }
 0x186   : > { %p1081_p1 = pnand %p1579_p0, %p1328_p11 }
 0x188   : > { %p1082_p3 = pneg %p1081_p1 }
 0x18a   : > { %1225 = dma.done.wait (%p1082_p3), %s989_s23, 32  }
 0x18b   : > { %1227 = vsyncadd (%p1082_p3), %s989_s23, 4294967264  ;;  %s17_s11 = sadd.s32 1, %s1250_s11   ;;  %s1580_s6 = smov %s1234_s7 }
 0x18c   : > { %p14_p5 = scmp.ge.s32.totalorder %s17_s11, 4   ;;  %s1581_s7 = smov %s1238_s8 }
 0x18d   : > { %s1582_s8 = smov %s1326_s20  ;;  %s1583_s9 = smov %s1246_s10 }
 0x18e   : > { %s1584_s10 = smov %s1586_s14  ;;  %16 = sbr.rel (!%p14_p5) target bundleno = 6 (0x6), region = 77 }
 0x193   :  { %994 = vsyncpa [#allocation5], 1 }
 0x194   :  { %996 = vsyncpa [#allocation5 + $0x1], 1 }
 0x195   :  { %997 = vsyncpa [#allocation6], 1 }
 0x196   :  { %999 = vsyncpa [#allocation6 + $0x1], 1 }

</bundles_post_ra>
